<compile_context>
chip_gen: v7x
topology: tpu7x:2x2x1
jax: 0.10.0
libtpu: 0.0.40
codegen_flags: <defaults>
</compile_context>

<pallas_src>
import jax
import jax.numpy as jnp
from jax.experimental import pallas as pl
from jax.experimental.pallas import tpu as pltpu


def _round_up(x: int, m: int) -> int:
    return ((x + m - 1) // m) * m


def _make_csm_kernel(sentence_size: int):
    """Builds the Pallas kernel body for the given sentence size (5 or 7)."""

    def _conv_tanh(x, k):
        # x: (L_in, TB, EP), k: (h, EP)  ->  (L_in - h + 1, TB, EP)
        h = k.shape[0]
        L = x.shape[0] - h + 1
        acc = x[0:L] * k[0][None, None, :]
        for t in range(1, h):  # h is static (2 or 3) -> fully unrolled VPU ops
            acc = acc + x[t:t + L] * k[t][None, None, :]
        return jnp.tanh(acc)

    def kernel(x_ref, c1_ref, c2_ref, c3_ref, *rest):
        if sentence_size == 7:
            c4_ref, o_ref = rest
        else:
            (o_ref,) = rest

        x = x_ref[...].astype(jnp.float32)               # (S, TB, EP)
        x = _conv_tanh(x, c1_ref[...].astype(jnp.float32))   # (S-1, TB, EP)
        x = _conv_tanh(x, c2_ref[...].astype(jnp.float32))   # (S-2, TB, EP)
        x = _conv_tanh(x, c3_ref[...].astype(jnp.float32))   # (S-4, TB, EP)
        if sentence_size == 7:
            x = _conv_tanh(x, c4_ref[...].astype(jnp.float32))  # (1, TB, EP)
        # Final seq length is 1 for both S=5 and S=7 -> (TB, EP) slab.
        o_ref[...] = x[0].astype(o_ref.dtype)

    return kernel


def csm_forward(x, conv1, conv2, conv3, conv4=None, *, sentence_size,
                block_rows=None):
    """Pallas wrapper. x: (B, S, E) -> (B, E) float32."""
    assert sentence_size in (5, 7)
    B, S, E = x.shape
    assert S == sentence_size

    weights = [conv1, conv2, conv3]
    if sentence_size == 7:
        assert conv4 is not None
        weights.append(conv4)

    # ---- lane packing: fold P batch rows into the lane axis when E < 128 ----
    P = (128 // E) if (E < 128 and 128 % E == 0) else 1
    EP = E * P

    b_pack = -(-B // P)                       # packed batch rows
    # Packed rows per grid step: keep the input block ~2 MiB, multiple of 8.
    if block_rows is None:
        tb = (2 * 1024 * 1024) // (S * EP * 4)
        tb = max(8, (tb // 8) * 8)
        block_rows = min(tb, 1024)
    TB = min(block_rows, _round_up(b_pack, 8))
    b_pad = _round_up(b_pack, TB)             # padded packed-row count
    B_full = b_pad * P                        # padded raw batch

    # TODO(synk): feeding x as bfloat16 would halve HBM read traffic; compute
    # stays f32 because of the in-kernel astype.
    xf = x.astype(jnp.float32)
    if B_full != B:
        xf = jnp.pad(xf, ((0, B_full - B), (0, 0), (0, 0)))
    # (B_full, S, E) -> (S, B_full, E) -> (S, b_pad, P*E): packed row bp holds
    # batches bp*P .. bp*P+P-1 in consecutive lane blocks.
    xp = jnp.transpose(xf, (1, 0, 2)).reshape(S, b_pad, EP)

    # Lane-tile each conv weight so lane block p sees the same (h, E) kernel.
    wp = [jnp.tile(w.astype(jnp.float32), (1, P)) for w in weights]

    grid = (b_pad // TB,)
    in_specs = [pl.BlockSpec((S, TB, EP), lambda i: (0, i, 0))]
    # Grid-invariant weights: whole-array VMEM residency, no per-step DMA.
    in_specs += [pl.BlockSpec(memory_space=pltpu.MemorySpace.VMEM)] * len(wp)
    out_spec = pl.BlockSpec((TB, EP), lambda i: (i, 0))

    # Advisory cost estimate (memory-bound kernel).
    seq_lens, L = [], S
    for w in weights:
        L = L - w.shape[0] + 1
        seq_lens.append(L)
    flops = int(sum(B * E * l * 2 * w.shape[0] for l, w in zip(seq_lens, weights)))
    transcendentals = int(sum(B * E * l for l in seq_lens))
    bytes_accessed = int(B * S * E * 4 + sum(w.size for w in weights) * 4 + B * E * 4)

    out = pl.pallas_call(
        _make_csm_kernel(sentence_size),
        out_shape=jax.ShapeDtypeStruct((b_pad, EP), jnp.float32),
        grid_spec=pl.GridSpec(grid=grid, in_specs=in_specs, out_specs=out_spec),
        compiler_params=pltpu.CompilerParams(
            dimension_semantics=("parallel",)),
        cost_estimate=pl.CostEstimate(
            flops=flops, transcendentals=transcendentals,
            bytes_accessed=bytes_accessed),
    )(xp, *wp)

    # (b_pad, P*E) -> (b_pad*P, E) = (B_full, E); drop padded rows.
    return out.reshape(B_full, E)[:B]


def _csm_reference(x, conv1, conv2, conv3, conv4=None, *, sentence_size):
    """Pure-JAX reference mirroring the PyTorch module."""
    def conv(x, k):
        h = k.shape[0]
        L = x.shape[1] - h + 1
        acc = jnp.zeros((x.shape[0], L, x.shape[2]), jnp.float32)
        for t in range(h):
            acc = acc + x[:, t:t + L, :] * k[t][None, None, :]
        return acc

    x = jnp.tanh(conv(x, conv1))
    x = jnp.tanh(conv(x, conv2))
    x = jnp.tanh(conv(x, conv3))
    if sentence_size == 7:
        x = jnp.tanh(conv(x, conv4))
    return x.reshape(x.shape[0], -1)


if __name__ == "__main__":
    key = jax.random.PRNGKey(0)

    # ---- sentence_size = 7 (uses conv4) ----
    B, S, E = 2, 7, 32
    kx, k1, k2, k3, k4, k5 = jax.random.split(key, 6)
    x = jax.random.normal(kx, (B, S, E), dtype=jnp.float32)
    conv1 = jax.random.normal(k1, (2, E), dtype=jnp.float32)
    conv2 = jax.random.normal(k2, (2, E), dtype=jnp.float32)
    conv3 = jax.random.normal(k3, (3, E), dtype=jnp.float32)
    conv4 = jax.random.normal(k4, (3, E), dtype=jnp.float32)

    out7 = csm_forward(x, conv1, conv2, conv3, conv4, sentence_size=S)
    out7 = jax.block_until_ready(out7)
    ref7 = _csm_reference(x, conv1, conv2, conv3, conv4, sentence_size=S)
    assert out7.shape == (B, E)
    assert jnp.allclose(out7, ref7, atol=1e-5, rtol=1e-5)

    # ---- sentence_size = 5 (three convs) ----
    B5, S5 = 3, 5
    x5 = jax.random.normal(k5, (B5, S5, E), dtype=jnp.float32)
    out5 = csm_forward(x5, conv1, conv2, conv3, sentence_size=S5)
    out5 = jax.block_until_ready(out5)
    ref5 = _csm_reference(x5, conv1, conv2, conv3, sentence_size=S5)
    assert out5.shape == (B5, E)
    assert jnp.allclose(out5, ref5, atol=1e-5, rtol=1e-5)

    print("KERNEL_OK")
</pallas_src>

<mosaic_0001>
module attributes {stable_mosaic.version = 11 : i64} {
  func.func @kernel(%arg0: i32, %arg1: memref<7x8x128xf32, #tpu.memory_space<vmem>>, %arg2: memref<2x128xf32, #tpu.memory_space<vmem>>, %arg3: memref<2x128xf32, #tpu.memory_space<vmem>>, %arg4: memref<3x128xf32, #tpu.memory_space<vmem>>, %arg5: memref<3x128xf32, #tpu.memory_space<vmem>>, %arg6: memref<8x128xf32, #tpu.memory_space<vmem>>) attributes {dimension_semantics = [#tpu.dimension_semantics<parallel>], iteration_bounds = array<i64: 1>, scalar_prefetch = 0 : i64, scratch_operands = 0 : i64, tpu.core_type = #tpu.core_type<tc>, window_params = [{transform_indices = @transform_0, window_bounds = array<i64: 7, 8, 128>}, {pipeline_mode = #tpu.pipeline_mode<synchronous>, transform_indices = @transform_1, window_bounds = array<i64: 2, 128>}, {pipeline_mode = #tpu.pipeline_mode<synchronous>, transform_indices = @transform_2, window_bounds = array<i64: 2, 128>}, {pipeline_mode = #tpu.pipeline_mode<synchronous>, transform_indices = @transform_3, window_bounds = array<i64: 3, 128>}, {pipeline_mode = #tpu.pipeline_mode<synchronous>, transform_indices = @transform_4, window_bounds = array<i64: 3, 128>}, {transform_indices = @transform_5, window_bounds = array<i64: 8, 128>}]} {
    %c0 = arith.constant 0 : index
    %c0_0 = arith.constant 0 : index
    %c0_1 = arith.constant 0 : index
    %0 = vector.load %arg1[%c0, %c0_0, %c0_1] : memref<7x8x128xf32, #tpu.memory_space<vmem>>, vector<7x8x128xf32>
    %c0_2 = arith.constant 0 : index
    %c0_3 = arith.constant 0 : index
    %1 = vector.load %arg2[%c0_2, %c0_3] : memref<2x128xf32, #tpu.memory_space<vmem>>, vector<2x128xf32>
    %2 = vector.extract_strided_slice %0 {offsets = [0, 0, 0], sizes = [6, 8, 128], strides = [1, 1, 1]} : vector<7x8x128xf32> to vector<6x8x128xf32>
    %3 = vector.extract_strided_slice %1 {offsets = [0, 0], sizes = [1, 128], strides = [1, 1]} : vector<2x128xf32> to vector<1x128xf32>
    %4 = vector.shape_cast %3 : vector<1x128xf32> to vector<128xf32>
    %5 = vector.shape_cast %4 : vector<128xf32> to vector<1x1x128xf32>
    %6 = vector.broadcast %5 : vector<1x1x128xf32> to vector<6x8x128xf32>
    %7 = arith.mulf %2, %6 : vector<6x8x128xf32>
    %8 = vector.extract_strided_slice %0 {offsets = [1, 0, 0], sizes = [6, 8, 128], strides = [1, 1, 1]} : vector<7x8x128xf32> to vector<6x8x128xf32>
    %9 = vector.extract_strided_slice %1 {offsets = [1, 0], sizes = [1, 128], strides = [1, 1]} : vector<2x128xf32> to vector<1x128xf32>
    %10 = vector.shape_cast %9 : vector<1x128xf32> to vector<128xf32>
    %11 = vector.shape_cast %10 : vector<128xf32> to vector<1x1x128xf32>
    %12 = vector.broadcast %11 : vector<1x1x128xf32> to vector<6x8x128xf32>
    %13 = arith.mulf %8, %12 : vector<6x8x128xf32>
    %14 = arith.addf %7, %13 : vector<6x8x128xf32>
    %15 = math.tanh %14 : vector<6x8x128xf32>
    %c0_4 = arith.constant 0 : index
    %c0_5 = arith.constant 0 : index
    %16 = vector.load %arg3[%c0_4, %c0_5] : memref<2x128xf32, #tpu.memory_space<vmem>>, vector<2x128xf32>
    %17 = vector.extract_strided_slice %15 {offsets = [0, 0, 0], sizes = [5, 8, 128], strides = [1, 1, 1]} : vector<6x8x128xf32> to vector<5x8x128xf32>
    %18 = vector.extract_strided_slice %16 {offsets = [0, 0], sizes = [1, 128], strides = [1, 1]} : vector<2x128xf32> to vector<1x128xf32>
    %19 = vector.shape_cast %18 : vector<1x128xf32> to vector<128xf32>
    %20 = vector.shape_cast %19 : vector<128xf32> to vector<1x1x128xf32>
    %21 = vector.broadcast %20 : vector<1x1x128xf32> to vector<5x8x128xf32>
    %22 = arith.mulf %17, %21 : vector<5x8x128xf32>
    %23 = vector.extract_strided_slice %15 {offsets = [1, 0, 0], sizes = [5, 8, 128], strides = [1, 1, 1]} : vector<6x8x128xf32> to vector<5x8x128xf32>
    %24 = vector.extract_strided_slice %16 {offsets = [1, 0], sizes = [1, 128], strides = [1, 1]} : vector<2x128xf32> to vector<1x128xf32>
    %25 = vector.shape_cast %24 : vector<1x128xf32> to vector<128xf32>
    %26 = vector.shape_cast %25 : vector<128xf32> to vector<1x1x128xf32>
    %27 = vector.broadcast %26 : vector<1x1x128xf32> to vector<5x8x128xf32>
    %28 = arith.mulf %23, %27 : vector<5x8x128xf32>
    %29 = arith.addf %22, %28 : vector<5x8x128xf32>
    %30 = math.tanh %29 : vector<5x8x128xf32>
    %c0_6 = arith.constant 0 : index
    %c0_7 = arith.constant 0 : index
    %31 = vector.load %arg4[%c0_6, %c0_7] : memref<3x128xf32, #tpu.memory_space<vmem>>, vector<3x128xf32>
    %32 = vector.extract_strided_slice %30 {offsets = [0, 0, 0], sizes = [3, 8, 128], strides = [1, 1, 1]} : vector<5x8x128xf32> to vector<3x8x128xf32>
    %33 = vector.extract_strided_slice %31 {offsets = [0, 0], sizes = [1, 128], strides = [1, 1]} : vector<3x128xf32> to vector<1x128xf32>
    %34 = vector.shape_cast %33 : vector<1x128xf32> to vector<128xf32>
    %35 = vector.shape_cast %34 : vector<128xf32> to vector<1x1x128xf32>
    %36 = vector.broadcast %35 : vector<1x1x128xf32> to vector<3x8x128xf32>
    %37 = arith.mulf %32, %36 : vector<3x8x128xf32>
    %38 = vector.extract_strided_slice %30 {offsets = [1, 0, 0], sizes = [3, 8, 128], strides = [1, 1, 1]} : vector<5x8x128xf32> to vector<3x8x128xf32>
    %39 = vector.extract_strided_slice %31 {offsets = [1, 0], sizes = [1, 128], strides = [1, 1]} : vector<3x128xf32> to vector<1x128xf32>
    %40 = vector.shape_cast %39 : vector<1x128xf32> to vector<128xf32>
    %41 = vector.shape_cast %40 : vector<128xf32> to vector<1x1x128xf32>
    %42 = vector.broadcast %41 : vector<1x1x128xf32> to vector<3x8x128xf32>
    %43 = arith.mulf %38, %42 : vector<3x8x128xf32>
    %44 = arith.addf %37, %43 : vector<3x8x128xf32>
    %45 = vector.extract_strided_slice %30 {offsets = [2, 0, 0], sizes = [3, 8, 128], strides = [1, 1, 1]} : vector<5x8x128xf32> to vector<3x8x128xf32>
    %46 = vector.extract_strided_slice %31 {offsets = [2, 0], sizes = [1, 128], strides = [1, 1]} : vector<3x128xf32> to vector<1x128xf32>
    %47 = vector.shape_cast %46 : vector<1x128xf32> to vector<128xf32>
    %48 = vector.shape_cast %47 : vector<128xf32> to vector<1x1x128xf32>
    %49 = vector.broadcast %48 : vector<1x1x128xf32> to vector<3x8x128xf32>
    %50 = arith.mulf %45, %49 : vector<3x8x128xf32>
    %51 = arith.addf %44, %50 : vector<3x8x128xf32>
    %52 = math.tanh %51 : vector<3x8x128xf32>
    %c0_8 = arith.constant 0 : index
    %c0_9 = arith.constant 0 : index
    %53 = vector.load %arg5[%c0_8, %c0_9] : memref<3x128xf32, #tpu.memory_space<vmem>>, vector<3x128xf32>
    %54 = vector.extract_strided_slice %52 {offsets = [0, 0, 0], sizes = [1, 8, 128], strides = [1, 1, 1]} : vector<3x8x128xf32> to vector<1x8x128xf32>
    %55 = vector.extract_strided_slice %53 {offsets = [0, 0], sizes = [1, 128], strides = [1, 1]} : vector<3x128xf32> to vector<1x128xf32>
    %56 = vector.shape_cast %55 : vector<1x128xf32> to vector<128xf32>
    %57 = vector.shape_cast %56 : vector<128xf32> to vector<1x1x128xf32>
    %58 = vector.broadcast %57 : vector<1x1x128xf32> to vector<1x8x128xf32>
    %59 = arith.mulf %54, %58 : vector<1x8x128xf32>
    %60 = vector.extract_strided_slice %52 {offsets = [1, 0, 0], sizes = [1, 8, 128], strides = [1, 1, 1]} : vector<3x8x128xf32> to vector<1x8x128xf32>
    %61 = vector.extract_strided_slice %53 {offsets = [1, 0], sizes = [1, 128], strides = [1, 1]} : vector<3x128xf32> to vector<1x128xf32>
    %62 = vector.shape_cast %61 : vector<1x128xf32> to vector<128xf32>
    %63 = vector.shape_cast %62 : vector<128xf32> to vector<1x1x128xf32>
    %64 = vector.broadcast %63 : vector<1x1x128xf32> to vector<1x8x128xf32>
    %65 = arith.mulf %60, %64 : vector<1x8x128xf32>
    %66 = arith.addf %59, %65 : vector<1x8x128xf32>
    %67 = vector.extract_strided_slice %52 {offsets = [2, 0, 0], sizes = [1, 8, 128], strides = [1, 1, 1]} : vector<3x8x128xf32> to vector<1x8x128xf32>
    %68 = vector.extract_strided_slice %53 {offsets = [2, 0], sizes = [1, 128], strides = [1, 1]} : vector<3x128xf32> to vector<1x128xf32>
    %69 = vector.shape_cast %68 : vector<1x128xf32> to vector<128xf32>
    %70 = vector.shape_cast %69 : vector<128xf32> to vector<1x1x128xf32>
    %71 = vector.broadcast %70 : vector<1x1x128xf32> to vector<1x8x128xf32>
    %72 = arith.mulf %67, %71 : vector<1x8x128xf32>
    %73 = arith.addf %66, %72 : vector<1x8x128xf32>
    %74 = math.tanh %73 : vector<1x8x128xf32>
    %75 = vector.shape_cast %74 : vector<1x8x128xf32> to vector<8x128xf32>
    %c0_10 = arith.constant 0 : index
    %c0_11 = arith.constant 0 : index
    %76 = vector.load %arg6[%c0_10, %c0_11] : memref<8x128xf32, #tpu.memory_space<vmem>>, vector<8x128xf32>
    tpu.vector_store %arg6[%c0_10, %c0_11], %75 {strides = array<i32>} : memref<8x128xf32, #tpu.memory_space<vmem>>, vector<8x128xf32>,
    return
  }
  func.func @transform_0(%arg0: i32) -> (i32, i32, i32) {
    %c0_i32 = arith.constant 0 : i32
    %c0_i32_0 = arith.constant 0 : i32
    %c0_i32_1 = arith.constant 0 : i32
    return %c0_i32, %arg0, %c0_i32_0 : i32, i32, i32
  }
  func.func @transform_1(%arg0: i32) -> (i32, i32) {
    %c0_i32 = arith.constant 0 : i32
    %c0_i32_0 = arith.constant 0 : i32
    %c0_i32_1 = arith.constant 0 : i32
    return %c0_i32, %c0_i32_0 : i32, i32
  }
  func.func @transform_2(%arg0: i32) -> (i32, i32) {
    %c0_i32 = arith.constant 0 : i32
    %c0_i32_0 = arith.constant 0 : i32
    %c0_i32_1 = arith.constant 0 : i32
    return %c0_i32, %c0_i32_0 : i32, i32
  }
  func.func @transform_3(%arg0: i32) -> (i32, i32) {
    %c0_i32 = arith.constant 0 : i32
    %c0_i32_0 = arith.constant 0 : i32
    %c0_i32_1 = arith.constant 0 : i32
    return %c0_i32, %c0_i32_0 : i32, i32
  }
  func.func @transform_4(%arg0: i32) -> (i32, i32) {
    %c0_i32 = arith.constant 0 : i32
    %c0_i32_0 = arith.constant 0 : i32
    %c0_i32_1 = arith.constant 0 : i32
    return %c0_i32, %c0_i32_0 : i32, i32
  }
  func.func @transform_5(%arg0: i32) -> (i32, i32) {
    %c0_i32 = arith.constant 0 : i32
    %c0_i32_0 = arith.constant 0 : i32
    return %arg0, %c0_i32 : i32, i32
  }
}

</mosaic_0001>

<bundles_post_ra>
// kernel: tpu_custom_call.1
= control target key start
LH: loop header
LB: loop body
LE: loop exit
PB: predicated region body
PF: predicated region fallthrough
CT: control target
= control target key end

     0   :  { %10 = vsyncpa [#allocation3], 0  ;;  %s387_s0 = inlined_call_operand.hbm [shape: f32[7,8,128], index: 0, kind: input, shape index: {}]   ;;  %s388_s1 = inlined_call_operand.vmem [shape: f32[2,128], index: 1, kind: input, shape index: {}]   ;;  %s389_s2 = inlined_call_operand.hbm [shape: f32[2,128], index: 2, kind: input, shape index: {}]   ;;  %s390_s3 = inlined_call_operand.vmem [shape: f32[3,128], index: 3, kind: input, shape index: {}]   ;;  %s391_s4 = inlined_call_operand.vmem [shape: f32[3,128], index: 4, kind: input, shape index: {}]   ;;  %s392_s5 = inlined_call_operand.hbm [shape: f32[8,128], index: 5, kind: output, shape index: {}]  }
   0x1   :  { %11 = vsyncpa [#allocation6], 0 }
   0x2   :  { %12 = vsyncpa [#allocation4], 0  ;;  %s290_s18 = smov [#allocation2]   ;;  %s218_s22 = scalar_lea.hbm %s387_s0, 896 }
   0x3   :  { %s18_s19 = sshll.u32 %s290_s18, 4  ;;  %p219_p0 = scmp.ne.s32.totalorder %s387_s0, %s218_s22  ;;  %s19_s19 = int_to_ptr.vmem [resolvable:$true] %s18_s19 }
   0x4   :  { %p222_p1 = scmp.lt.u32.totalorder %s218_s22, %s387_s0 }
   0x6   :  { %p224_p2 = pnand %p222_p1, %p219_p0 }
   0x8   :  { %227 = shalt.err (!%p224_p2)
}
   0x9   :  { %s228_s27 = scalar_lea.vmem %s19_s19, 896  ;;  %p233_p4 = scmp.lt.s32.totalorder %s19_s19, %s19_s19 }
   0xa   :  { %p229_p3 = scmp.ne.s32.totalorder %s19_s19, %s228_s27  ;;  %p234_p5 = scmp.lt.s32.totalorder %s228_s27, %s228_s27 }
   0xc   :  { %p235_p6 = por %p234_p5, %p233_p4 }
   0xe   :  { %p236_p7 = pnand %p235_p6, %p229_p3 }
  0x10   :  { %239 = shalt.err (!%p236_p7)
}
  0x11   :  { %s291_s28 = smov 128   ;;  %s292_s29 = smov 8  }
  0x12   :  { %24 = dma.hbm_to_vmem [thread:$0]  %s387_s0, 896, %s19_s19, [#allocation3], %s291_s28, %s291_s28, %s292_s29  }
  0x13   :  { %s293_s7 = smov [#allocation5]   ;;  %s240_s11 = scalar_lea.hbm %s389_s2, 32 }
  0x14   :  { %s33_s8 = sshll.u32 %s293_s7, 4  ;;  %p241_p8 = scmp.ne.s32.totalorder %s389_s2, %s240_s11  ;;  %s34_s8 = int_to_ptr.vmem [resolvable:$true] %s33_s8 }
  0x15   :  { %p244_p9 = scmp.lt.u32.totalorder %s240_s11, %s389_s2 }
  0x17   :  { %p246_p10 = pnand %p244_p9, %p241_p8 }
  0x19   :  { %249 = shalt.err (!%p246_p10)
}
  0x1a   :  { %s250_s16 = scalar_lea.vmem %s34_s8, 32  ;;  %p255_p12 = scmp.lt.s32.totalorder %s34_s8, %s34_s8 }
  0x1b   :  { %p251_p11 = scmp.ne.s32.totalorder %s34_s8, %s250_s16  ;;  %p256_p13 = scmp.lt.s32.totalorder %s250_s16, %s250_s16 }
  0x1d   :  { %p257_p0 = por %p256_p13, %p255_p12 }
  0x1f   :  { %p258_p1 = pnand %p257_p0, %p251_p11 }
  0x21   :  { %261 = shalt.err (!%p258_p1)
}
  0x22   :  { %36 = dma.hbm_to_vmem [thread:$0]  %s389_s2, 32, %s34_s8, [#allocation6]  }
  0x23   :  { %284 = dma.done.wait [#allocation3], 896  }
  0x24   :  { %285 = vsyncadd [#allocation3], 4294966400 }
  0x25   :  { %286 = dma.done.wait [#allocation6], 32  }
  0x26   :  { %287 = vsyncadd [#allocation6], 4294967264  ;;  %v55_v0 = vlaneseq  ;;  %v47_v4 = vld [vmem:[#allocation2] sm:$0xff]  ;;  %v48_v5 = vld [vmem:[#allocation2 + $0x8] sm:$0xff]  ;;  %s294_s21 = smov [#allocation7]  }
  0x27   :  { %v49_v6 = vld [vmem:[#allocation2 + $0x10] sm:$0xff]  ;;  %v50_v7 = vld [vmem:[#allocation2 + $0x18] sm:$0xff]  ;;  %v54_v8 = vld [vmem:[%s388_s1] sm:$0x3]  ;;  %s173_s22 = sshll.u32 %s294_s21, 4  ;;  %s174_s22 = int_to_ptr.vmem [resolvable:$true] %s173_s22 }
  0x28   :  { %v349_v1 = vshrl.u32 %v55_v0, 7  ;;  %v51_v11 = vld [vmem:[#allocation2 + $0x20] sm:$0xff]  ;;  %v52_v12 = vld [vmem:[#allocation2 + $0x28] sm:$0xff]  ;;  %v53_v13 = vld [vmem:[#allocation2 + $0x30] sm:$0xff]  ;;  %p267_p3 = scmp.lt.s32.totalorder %s174_s22, %s174_s22 }
  0x29   :  { %v87_v32 = vld [vmem:[#allocation5] sm:$0x3]  ;;  %v116_v56 = vld [vmem:[%s390_s3] sm:$0x7] }
  0x2a   :  { %v352_v2 = vsub.s32 0, %v349_v1  ;;  %v355_v3 = vsub.s32 1, %v349_v1  ;;  %v136_v57 = vsub.s32 2, %v349_v1 }
  0x2c   :  { %v58_v9 = vrot.slane %v54_v8, %v352_v2  ;;  %v68_v10 = vrot.slane %v54_v8, %v355_v3  ;;  %v91_v33 = vrot.slane %v87_v32, %v352_v2  ;;  %v100_v34 = vrot.slane %v87_v32, %v355_v3 }
  0x2d   :  { %v120_v58 = vrot.slane %v116_v56, %v352_v2  ;;  %v127_v59 = vrot.slane %v116_v56, %v355_v3  ;;  %v137_v60 = vrot.slane %v116_v56, %v136_v57 }
  0x2e   :  { %v59_v14 = vmul.f32 %v58_v9, %v47_v4  ;;  %v60_v15 = vmul.f32 %v58_v9, %v48_v5  ;;  %v61_v16 = vmul.f32 %v58_v9, %v49_v6  ;;  %v62_v17 = vmul.f32 %v58_v9, %v50_v7 }
  0x2f   :  { %v63_v18 = vmul.f32 %v58_v9, %v51_v11  ;;  %v64_v19 = vmul.f32 %v58_v9, %v52_v12  ;;  %v69_v20 = vmul.f32 %v68_v10, %v48_v5  ;;  %v70_v21 = vmul.f32 %v68_v10, %v49_v6 }
  0x30   :  { %v71_v22 = vmul.f32 %v68_v10, %v50_v7  ;;  %v72_v23 = vmul.f32 %v68_v10, %v51_v11  ;;  %v73_v24 = vmul.f32 %v68_v10, %v52_v12  ;;  %v74_v25 = vmul.f32 %v68_v10, %v53_v13 }
  0x31   :  { %v75_v26 = vadd.f32 %v69_v20, %v59_v14  ;;  %v76_v27 = vadd.f32 %v70_v21, %v60_v15 }
  0x32   :  { %v77_v28 = vadd.f32 %v71_v22, %v61_v16  ;;  %v78_v29 = vadd.f32 %v72_v23, %v62_v17  ;;  %v79_v30 = vadd.f32 %v73_v24, %v63_v18  ;;  %v80_v31 = vadd.f32 %v74_v25, %v64_v19  ;;  %v147_v19 = vld [vmem:[%s391_s4] sm:$0x7]  ;;  %s262_s4 = scalar_lea.vmem %s174_s22, 128 }
  0x33   :  { %188 = vtanh.f32 %v75_v26  ;;  %v151_v20 = vrot.slane %v147_v19, %v352_v2  ;;  %v156_v21 = vrot.slane %v147_v19, %v355_v3  ;;  %v162_v22 = vrot.slane %v147_v19, %v136_v57  ;;  %p263_p2 = scmp.ne.s32.totalorder %s174_s22, %s262_s4  ;;  %p268_p4 = scmp.lt.s32.totalorder %s262_s4, %s262_s4 }
  0x34   :  { %190 = vtanh.f32 %v76_v27 }
  0x35   :  { %192 = vtanh.f32 %v77_v28  ;;  %p269_p5 = por %p268_p4, %p267_p3 }
  0x36   :  { %194 = vtanh.f32 %v78_v29 }
  0x37   :  { %196 = vtanh.f32 %v79_v30  ;;  %p270_p6 = pnand %p269_p5, %p263_p2 }
  0x38   :  { %198 = vtanh.f32 %v80_v31 }
  0x3d   :  { %v189_v35 = vpop.eup %188 }
  0x3e   :  { %v191_v36 = vpop.eup %190  ;;  %v92_v37 = vmul.f32 %v189_v35, %v91_v33 }
  0x3f   :  { %v193_v38 = vpop.eup %192  ;;  %v93_v39 = vmul.f32 %v191_v36, %v91_v33  ;;  %v101_v40 = vmul.f32 %v191_v36, %v100_v34 }
  0x40   :  { %v195_v41 = vpop.eup %194  ;;  %v94_v42 = vmul.f32 %v193_v38, %v91_v33  ;;  %v102_v43 = vmul.f32 %v193_v38, %v100_v34 }
  0x41   :  { %v197_v44 = vpop.eup %196  ;;  %v95_v45 = vmul.f32 %v195_v41, %v91_v33  ;;  %v103_v46 = vmul.f32 %v195_v41, %v100_v34  ;;  %v106_v47 = vadd.f32 %v101_v40, %v92_v37 }
  0x42   :  { %v199_v48 = vpop.eup %198  ;;  %v96_v49 = vmul.f32 %v197_v44, %v91_v33  ;;  %v104_v50 = vmul.f32 %v197_v44, %v100_v34  ;;  %v107_v51 = vadd.f32 %v102_v43, %v93_v39 }
  0x43   :  { %v105_v52 = vmul.f32 %v199_v48, %v100_v34  ;;  %v108_v53 = vadd.f32 %v103_v46, %v94_v42  ;;  %200 = vtanh.f32 %v106_v47 }
  0x44   :  { %v109_v54 = vadd.f32 %v104_v50, %v95_v45  ;;  %202 = vtanh.f32 %v107_v51 }
  0x45   :  { %v110_v55 = vadd.f32 %v105_v52, %v96_v49  ;;  %204 = vtanh.f32 %v108_v53 }
  0x46   :  { %206 = vtanh.f32 %v109_v54 }
  0x47   :  { %208 = vtanh.f32 %v110_v55 }
  0x4d   :  { %v201_v61 = vpop.eup %200 }
  0x4e   :  { %v203_v62 = vpop.eup %202  ;;  %v121_v63 = vmul.f32 %v201_v61, %v120_v58 }
  0x4f   :  { %v205_v0 = vpop.eup %204  ;;  %v122_v4 = vmul.f32 %v203_v62, %v120_v58  ;;  %v128_v5 = vmul.f32 %v203_v62, %v127_v59 }
  0x50   :  { %v207_v6 = vpop.eup %206  ;;  %v123_v7 = vmul.f32 %v205_v0, %v120_v58  ;;  %v129_v8 = vmul.f32 %v205_v0, %v127_v59  ;;  %v138_v9 = vmul.f32 %v205_v0, %v137_v60 }
  0x51   :  { %v209_v10 = vpop.eup %208  ;;  %v130_v11 = vmul.f32 %v207_v6, %v127_v59  ;;  %v131_v12 = vadd.f32 %v128_v5, %v121_v63  ;;  %v139_v13 = vmul.f32 %v207_v6, %v137_v60 }
  0x52   :  { %v132_v1 = vadd.f32 %v129_v8, %v122_v4  ;;  %v140_v14 = vmul.f32 %v209_v10, %v137_v60 }
  0x53   :  { %v133_v15 = vadd.f32 %v130_v11, %v123_v7  ;;  %v141_v16 = vadd.f32 %v138_v9, %v131_v12 }
  0x54   :  { %v142_v17 = vadd.f32 %v139_v13, %v132_v1 }
  0x55   :  { %v143_v18 = vadd.f32 %v140_v14, %v133_v15  ;;  %210 = vtanh.f32 %v141_v16 }
  0x56   :  { %212 = vtanh.f32 %v142_v17 }
  0x57   :  { %214 = vtanh.f32 %v143_v18 }
  0x5f   :  { %v211_v23 = vpop.eup %210 }
  0x60   :  { %v213_v24 = vpop.eup %212  ;;  %v152_v25 = vmul.f32 %v211_v23, %v151_v20 }
  0x61   :  { %v215_v26 = vpop.eup %214  ;;  %v157_v27 = vmul.f32 %v213_v24, %v156_v21 }
  0x62   :  { %v163_v28 = vmul.f32 %v215_v26, %v162_v22 }
  0x63   :  { %v158_v29 = vadd.f32 %v157_v27, %v152_v25 }
  0x65   :  { %v164_v30 = vadd.f32 %v163_v28, %v158_v29 }
  0x67   :  { %216 = vtanh.f32 %v164_v30 }
  0x71   :  { %v217_v31 = vpop.eup %216 }
  0x72   :  { %166 = vst [vmem:[#allocation7] sm:$0xff] %v217_v31 }
  0x73   :  { %273 = shalt.err (!%p270_p6)
}
  0x74   :  { %s274_s25 = scalar_lea.hbm %s392_s5, 128 }
  0x75   :  { %p275_p7 = scmp.ne.s32.totalorder %s392_s5, %s274_s25  ;;  %p278_p8 = scmp.lt.u32.totalorder %s274_s25, %s392_s5 }
  0x77   :  { %p280_p9 = pnand %p278_p8, %p275_p7 }
  0x79   :  { %283 = shalt.err (!%p280_p9)
}
  0x7a   :  { %176 = dma.vmem_to_hbm [thread:$0]  %s174_s22, 128, %s392_s5, [#allocation4]  }
  0x7b   :  { %288 = dma.done.wait [#allocation4], 128  }
  0x7c   :  { %289 = vsyncadd [#allocation4], 4294967168 }
  0x7d   :  { %180 = vsyncpa [#allocation3], 1 }
  0x7e   :  { %181 = vsyncpa [#allocation6], 1 }
  0x7f   :  { %182 = vsyncpa [#allocation4], 1 }

</bundles_post_ra>
